<compile_context>
chip_gen: v7x
topology: tpu7x:2x2x1
jax: 0.10.0
libtpu: 0.0.40
codegen_flags: <defaults>
</compile_context>

<pallas_src>
import functools

import jax
import jax.numpy as jnp
from jax import lax
from jax.experimental import pallas as pl
from jax.experimental.pallas import tpu as pltpu

IN_DIM = 10
HID = 14
CLASSES = 7
HEADS = CLASSES + 1          # fused head: rows [0:7] = fc_class, row [7] = fc_source

# Sublane-aligned offsets inside the packed bias operand.
B1_OFF = 0
B2_OFF = 16
BH_OFF = 32
PACK_ROWS = 40


def _disc_kernel(x_ref, w1_ref, w2_ref, wh_ref, b_ref, out_ref, *, chunk, n_chunks):
    """Forward on one batch tile.  Layout inside the kernel is (features, lanes=batch)."""
    # Weights / biases: tiny, VMEM-resident across grid steps (constant index_map).
    # Upcast once to f32 so tanh/exp math is f32 on every TPU generation.
    w1 = w1_ref[...].astype(jnp.float32)                                # (14, 10)
    w2 = w2_ref[...].astype(jnp.float32)                                # (14, 14)
    wh = wh_ref[...].astype(jnp.float32)                                # (8, 14)
    b1 = b_ref[B1_OFF:B1_OFF + HID, :].astype(jnp.float32)              # (14, 1)
    b2 = b_ref[B2_OFF:B2_OFF + HID, :].astype(jnp.float32)              # (14, 1)
    bh = b_ref[BH_OFF:BH_OFF + HEADS, :].astype(jnp.float32)            # (8, 1)

    def body(j, carry):
        start = j * chunk
        # (chunk, 10) slab of the original x -> (10, chunk): single in-kernel
        # transpose (XLU); everything downstream is lane-dense on the batch axis.
        xt = x_ref[pl.ds(start, chunk), :].astype(jnp.float32).T        # (10, chunk)

        # c1: Linear(10,14) + Tanh    (computed transposed: W1 @ x^T + b1)
        h1 = jnp.tanh(jnp.dot(w1, xt, preferred_element_type=jnp.float32) + b1)
        # c2: Linear(14,14) + Tanh
        h2 = jnp.tanh(jnp.dot(w2, h1, preferred_element_type=jnp.float32) + b2)
        # Fused heads: one (8,14) @ (14,chunk) matmul.
        z = jnp.dot(wh, h2, preferred_element_type=jnp.float32) + bh    # (8, chunk)

        # fc_class + Softmax over the class (sublane) axis — exact divide so the
        # probabilities sum to 1 (approx reciprocal previously drifted > 1e-3).
        logits = z[:CLASSES, :]                                         # (7, chunk)
        e = jnp.exp(logits - jnp.max(logits, axis=0, keepdims=True))
        probs = e / jnp.sum(e, axis=0, keepdims=True)

        # fc_source + Sigmoid via tanh: exact, single EUP op, stays in [0, 1].
        rf = 0.5 * (1.0 + jnp.tanh(0.5 * z[CLASSES:HEADS, :]))          # (1, chunk)

        out_ref[:CLASSES, pl.ds(start, chunk)] = probs.astype(out_ref.dtype)
        out_ref[CLASSES:HEADS, pl.ds(start, chunk)] = rf.astype(out_ref.dtype)
        return carry

    lax.fori_loop(0, n_chunks, body, 0, unroll=True)


def _pick_tiles(batch, block_b, chunk):
    """Pick (batch_tile, inner_chunk) so tile % chunk == 0 and the grid has >=2 steps
    when the batch is large enough (keeps both v7x TensorCores busy)."""
    if batch <= chunk:
        return batch, batch
    half = pl.cdiv(pl.cdiv(batch, 2), chunk) * chunk
    tb = max(chunk, min(block_b, half))
    return tb, chunk


def discriminator_forward(x, params, *, block_b=8192, chunk=512, io_dtype=None):
    """x: (B, 10).  Returns (rf (B,1), c (B,CLASSES)) like the PyTorch module."""
    B = x.shape[0]
    io_dtype = io_dtype or x.dtype

    tb, ck = _pick_tiles(B, block_b, chunk)
    n_chunks = tb // ck
    grid = (pl.cdiv(B, tb),)

    cast = lambda a: a.astype(io_dtype)

    # Fused head weight (classes first, source row last).
    wh = jnp.concatenate([params["wc"], params["ws"]], axis=0)          # (8, 14)

    # All biases packed into one sublane-aligned resident operand.
    bpack = jnp.zeros((PACK_ROWS, 1), jnp.float32)
    bpack = bpack.at[B1_OFF:B1_OFF + HID].set(params["b1"])
    bpack = bpack.at[B2_OFF:B2_OFF + HID].set(params["b2"])
    bpack = bpack.at[BH_OFF:BH_OFF + CLASSES].set(params["bc"])
    bpack = bpack.at[BH_OFF + CLASSES:BH_OFF + HEADS].set(params["bs"])

    resident = lambda shape: pl.BlockSpec(shape, lambda i: (0, 0))

    out = pl.pallas_call(
        functools.partial(_disc_kernel, chunk=ck, n_chunks=n_chunks),
        grid=grid,
        out_shape=jax.ShapeDtypeStruct((HEADS, B), io_dtype),
        in_specs=[
            pl.BlockSpec((tb, IN_DIM), lambda i: (i, 0)),    # x streamed over batch
            resident((HID, IN_DIM)),                         # w1
            resident((HID, HID)),                            # w2
            resident((HEADS, HID)),                          # fused head weight
            resident((PACK_ROWS, 1)),                        # packed biases
        ],
        out_specs=pl.BlockSpec((HEADS, tb), lambda i: (0, i)),
        compiler_params=pltpu.CompilerParams(
            dimension_semantics=("parallel",)),
    )(cast(x), cast(params["w1"]), cast(params["w2"]), cast(wh), cast(bpack))

    # Single fused slice+transpose back to the PyTorch-facing layout.
    out_t = out.T                                                       # (B, 8)
    c = out_t[:, :CLASSES]
    rf = out_t[:, CLASSES:HEADS]
    return rf, c


def init_params(key):
    """Deterministic synthetic parameters in PyTorch-native (out, in) orientation;
    biases are (out, 1) columns so they broadcast along the lane (batch) axis."""
    ks = jax.random.split(key, 8)

    def u(k, shape, fan_in):
        bound = 1.0 / jnp.sqrt(fan_in)
        return jax.random.uniform(k, shape, jnp.float32, -bound, bound)

    return {
        "w1": u(ks[0], (HID, IN_DIM), IN_DIM),
        "b1": u(ks[1], (HID, 1), IN_DIM),
        "w2": u(ks[2], (HID, HID), HID),
        "b2": u(ks[3], (HID, 1), HID),
        "ws": u(ks[4], (1, HID), HID),
        "bs": u(ks[5], (1, 1), HID),
        "wc": u(ks[6], (CLASSES, HID), HID),
        "bc": u(ks[7], (CLASSES, 1), HID),
    }


def _reference_forward(x, p):
    h1 = jnp.tanh(x @ p["w1"].T + p["b1"].T)
    h2 = jnp.tanh(h1 @ p["w2"].T + p["b2"].T)
    rf = jax.nn.sigmoid(h2 @ p["ws"].T + p["bs"].T)
    c = jax.nn.softmax(h2 @ p["wc"].T + p["bc"].T, axis=-1)
    return rf, c


if __name__ == "__main__":
    key = jax.random.PRNGKey(0)
    k_params, k_x, k_x2 = jax.random.split(key, 3)
    params = init_params(k_params)

    # --- small batch, f32 I/O -------------------------------------------------
    batch = 8
    x = jax.random.normal(k_x, (batch, IN_DIM), dtype=jnp.float32)
    rf, c = discriminator_forward(x, params)
    jax.block_until_ready((rf, c))

    rf_ref, c_ref = _reference_forward(x, params)
    assert rf.shape == (batch, 1) and c.shape == (batch, CLASSES)
    assert jnp.allclose(rf, rf_ref, atol=1e-4, rtol=1e-4)
    assert jnp.allclose(c, c_ref, atol=1e-4, rtol=1e-4)
    assert jnp.allclose(jnp.sum(c, axis=-1), 1.0, atol=1e-4)

    # --- larger ragged batch: exercises multi-step grid, inner sub-slice loop,
    # and a partial boundary tile (no host-side padding) ------------------------
    batch2 = 1000
    x2 = jax.random.normal(k_x2, (batch2, IN_DIM), dtype=jnp.float32)
    rf2, c2 = discriminator_forward(x2, params, block_b=1024, chunk=256)
    jax.block_until_ready((rf2, c2))
    rf2_ref, c2_ref = _reference_forward(x2, params)
    assert rf2.shape == (batch2, 1) and c2.shape == (batch2, CLASSES)
    assert jnp.allclose(rf2, rf2_ref, atol=1e-4, rtol=1e-4)
    assert jnp.allclose(c2, c2_ref, atol=1e-4, rtol=1e-4)
    assert jnp.allclose(jnp.sum(c2, axis=-1), 1.0, atol=1e-4)

    # --- bf16 I/O path (halves HBM traffic; in-kernel math stays f32) ----------
    rf_bf, c_bf = discriminator_forward(x, params, io_dtype=jnp.bfloat16)
    jax.block_until_ready((rf_bf, c_bf))
    xb = x.astype(jnp.bfloat16).astype(jnp.float32)
    pb = {k: v.astype(jnp.bfloat16).astype(jnp.float32) for k, v in params.items()}
    rf_bref, c_bref = _reference_forward(xb, pb)
    assert jnp.allclose(rf_bf.astype(jnp.float32), rf_bref, atol=2e-2)
    assert jnp.allclose(c_bf.astype(jnp.float32), c_bref, atol=2e-2)

    print("KERNEL_OK")
</pallas_src>

<mosaic_0001>
module attributes {stable_mosaic.version = 11 : i64} {
  func.func @_disc_kernel(%arg0: i32, %arg1: memref<8x10xf32, #tpu.memory_space<vmem>>, %arg2: memref<14x10xf32, #tpu.memory_space<vmem>>, %arg3: memref<14x14xf32, #tpu.memory_space<vmem>>, %arg4: memref<8x14xf32, #tpu.memory_space<vmem>>, %arg5: memref<40x1xf32, #tpu.memory_space<vmem>>, %arg6: memref<8x8xf32, #tpu.memory_space<vmem>>) attributes {dimension_semantics = [#tpu.dimension_semantics<parallel>], iteration_bounds = array<i64: 1>, scalar_prefetch = 0 : i64, scratch_operands = 0 : i64, tpu.core_type = #tpu.core_type<tc>, window_params = [{transform_indices = @transform_0, window_bounds = array<i64: 8, 10>}, {pipeline_mode = #tpu.pipeline_mode<synchronous>, transform_indices = @transform_1, window_bounds = array<i64: 14, 10>}, {pipeline_mode = #tpu.pipeline_mode<synchronous>, transform_indices = @transform_2, window_bounds = array<i64: 14, 14>}, {pipeline_mode = #tpu.pipeline_mode<synchronous>, transform_indices = @transform_3, window_bounds = array<i64: 8, 14>}, {pipeline_mode = #tpu.pipeline_mode<synchronous>, transform_indices = @transform_4, window_bounds = array<i64: 40, 1>}, {transform_indices = @transform_5, window_bounds = array<i64: 8, 8>}]} {
    %c0 = arith.constant 0 : index
    %c0_0 = arith.constant 0 : index
    %0 = vector.load %arg2[%c0, %c0_0] : memref<14x10xf32, #tpu.memory_space<vmem>>, vector<14x10xf32>
    %c0_1 = arith.constant 0 : index
    %c0_2 = arith.constant 0 : index
    %1 = vector.load %arg3[%c0_1, %c0_2] : memref<14x14xf32, #tpu.memory_space<vmem>>, vector<14x14xf32>
    %c0_3 = arith.constant 0 : index
    %c0_4 = arith.constant 0 : index
    %2 = vector.load %arg4[%c0_3, %c0_4] : memref<8x14xf32, #tpu.memory_space<vmem>>, vector<8x14xf32>
    %c0_5 = arith.constant 0 : index
    %c0_6 = arith.constant 0 : index
    %3 = vector.load %arg5[%c0_5, %c0_6] : memref<40x1xf32, #tpu.memory_space<vmem>>, vector<14x1xf32>
    %c16 = arith.constant 16 : index
    %c0_7 = arith.constant 0 : index
    %4 = vector.load %arg5[%c16, %c0_7] : memref<40x1xf32, #tpu.memory_space<vmem>>, vector<14x1xf32>
    %c32 = arith.constant 32 : index
    %c0_8 = arith.constant 0 : index
    %5 = vector.load %arg5[%c32, %c0_8] : memref<40x1xf32, #tpu.memory_space<vmem>>, vector<8x1xf32>
    %c0_i32 = arith.constant 0 : i32
    %c8_i32 = arith.constant 8 : i32
    %6 = arith.muli %c0_i32, %c8_i32 : i32
    %7 = arith.index_cast %6 : i32 to index
    %c0_9 = arith.constant 0 : index
    %8 = vector.load %arg1[%7, %c0_9] : memref<8x10xf32, #tpu.memory_space<vmem>>, vector<8x10xf32>
    %9 = tpu.transpose %8, [1, 0] : vector<8x10xf32> -> vector<10x8xf32>
    %cst = arith.constant dense<0.000000e+00> : vector<14x8xf32>
    %10 = tpu.matmul %0, %9, %cst {dimension_numbers = #tpu.dot_dimension_numbers<[1], [0], [0], [1], [0, 0, 1, 1], [], []>} : vector<14x10xf32>, vector<10x8xf32>, vector<14x8xf32> -> vector<14x8xf32>
    %11 = vector.broadcast %3 : vector<14x1xf32> to vector<14x8xf32>
    %12 = arith.addf %10, %11 : vector<14x8xf32>
    %13 = math.tanh %12 : vector<14x8xf32>
    %cst_10 = arith.constant dense<0.000000e+00> : vector<14x8xf32>
    %14 = tpu.matmul %1, %13, %cst_10 {dimension_numbers = #tpu.dot_dimension_numbers<[1], [0], [0], [1], [0, 0, 1, 1], [], []>} : vector<14x14xf32>, vector<14x8xf32>, vector<14x8xf32> -> vector<14x8xf32>
    %15 = vector.broadcast %4 : vector<14x1xf32> to vector<14x8xf32>
    %16 = arith.addf %14, %15 : vector<14x8xf32>
    %17 = math.tanh %16 : vector<14x8xf32>
    %cst_11 = arith.constant dense<0.000000e+00> : vector<8x8xf32>
    %18 = tpu.matmul %2, %17, %cst_11 {dimension_numbers = #tpu.dot_dimension_numbers<[1], [0], [0], [1], [0, 0, 1, 1], [], []>} : vector<8x14xf32>, vector<14x8xf32>, vector<8x8xf32> -> vector<8x8xf32>
    %19 = vector.broadcast %5 : vector<8x1xf32> to vector<8x8xf32>
    %20 = arith.addf %18, %19 : vector<8x8xf32>
    %21 = vector.extract_strided_slice %20 {offsets = [0, 0], sizes = [7, 8], strides = [1, 1]} : vector<8x8xf32> to vector<7x8xf32>
    %cst_12 = arith.constant dense<0xFF800000> : vector<8xf32>
    %22 = vector.multi_reduction <maximumf>, %21, %cst_12 [0] : vector<7x8xf32> to vector<8xf32>
    %23 = vector.shape_cast %22 : vector<8xf32> to vector<1x8xf32>
    %24 = vector.broadcast %23 : vector<1x8xf32> to vector<7x8xf32>
    %25 = arith.subf %21, %24 : vector<7x8xf32>
    %26 = math.exp %25 : vector<7x8xf32>
    %cst_13 = arith.constant dense<0.000000e+00> : vector<8xf32>
    %27 = vector.multi_reduction <add>, %26, %cst_13 [0] : vector<7x8xf32> to vector<8xf32>
    %28 = vector.shape_cast %27 : vector<8xf32> to vector<1x8xf32>
    %29 = vector.broadcast %28 : vector<1x8xf32> to vector<7x8xf32>
    %30 = arith.divf %26, %29 : vector<7x8xf32>
    %31 = vector.extract_strided_slice %20 {offsets = [7, 0], sizes = [1, 8], strides = [1, 1]} : vector<8x8xf32> to vector<1x8xf32>
    %cst_14 = arith.constant 5.000000e-01 : f32
    %32 = vector.broadcast %cst_14 : f32 to vector<1x8xf32>
    %33 = arith.mulf %32, %31 : vector<1x8xf32>
    %34 = math.tanh %33 : vector<1x8xf32>
    %cst_15 = arith.constant 1.000000e+00 : f32
    %35 = vector.broadcast %cst_15 : f32 to vector<1x8xf32>
    %36 = arith.addf %35, %34 : vector<1x8xf32>
    %cst_16 = arith.constant 5.000000e-01 : f32
    %37 = vector.broadcast %cst_16 : f32 to vector<1x8xf32>
    %38 = arith.mulf %37, %36 : vector<1x8xf32>
    %c0_17 = arith.constant 0 : index
    %39 = arith.index_cast %6 : i32 to index
    %40 = vector.load %arg6[%c0_17, %39] : memref<8x8xf32, #tpu.memory_space<vmem>>, vector<7x8xf32>
    tpu.vector_store %arg6[%c0_17, %39], %30 {strides = array<i32>} : memref<8x8xf32, #tpu.memory_space<vmem>>, vector<7x8xf32>,
    %c7 = arith.constant 7 : index
    %41 = arith.index_cast %6 : i32 to index
    %42 = vector.load %arg6[%c7, %41] : memref<8x8xf32, #tpu.memory_space<vmem>>, vector<1x8xf32>
    tpu.vector_store %arg6[%c7, %41], %38 {strides = array<i32>} : memref<8x8xf32, #tpu.memory_space<vmem>>, vector<1x8xf32>,
    %c1_i32 = arith.constant 1 : i32
    return
  }
  func.func @transform_0(%arg0: i32) -> (i32, i32) {
    %c0_i32 = arith.constant 0 : i32
    %c0_i32_0 = arith.constant 0 : i32
    return %arg0, %c0_i32 : i32, i32
  }
  func.func @transform_1(%arg0: i32) -> (i32, i32) {
    %c0_i32 = arith.constant 0 : i32
    %c0_i32_0 = arith.constant 0 : i32
    %c0_i32_1 = arith.constant 0 : i32
    return %c0_i32, %c0_i32_0 : i32, i32
  }
  func.func @transform_2(%arg0: i32) -> (i32, i32) {
    %c0_i32 = arith.constant 0 : i32
    %c0_i32_0 = arith.constant 0 : i32
    %c0_i32_1 = arith.constant 0 : i32
    return %c0_i32, %c0_i32_0 : i32, i32
  }
  func.func @transform_3(%arg0: i32) -> (i32, i32) {
    %c0_i32 = arith.constant 0 : i32
    %c0_i32_0 = arith.constant 0 : i32
    %c0_i32_1 = arith.constant 0 : i32
    return %c0_i32, %c0_i32_0 : i32, i32
  }
  func.func @transform_4(%arg0: i32) -> (i32, i32) {
    %c0_i32 = arith.constant 0 : i32
    %c0_i32_0 = arith.constant 0 : i32
    %c0_i32_1 = arith.constant 0 : i32
    return %c0_i32, %c0_i32_0 : i32, i32
  }
  func.func @transform_5(%arg0: i32) -> (i32, i32) {
    %c0_i32 = arith.constant 0 : i32
    %c0_i32_0 = arith.constant 0 : i32
    return %c0_i32, %arg0 : i32, i32
  }
}

</mosaic_0001>

<bundles_post_ra>
// kernel: tpu_custom_call.1
= control target key start
LH: loop header
LB: loop body
LE: loop exit
PB: predicated region body
PF: predicated region fallthrough
CT: control target
= control target key end

     0   :  { %vm42_vm0 = vcmask 80896   ;;  %v442_v4 = vmov 0   ;;  %s539_s0 = inlined_call_operand.vmem [shape: f32[8,10], index: 0, kind: input, shape index: {}]   ;;  %s540_s1 = inlined_call_operand.vmem [shape: f32[14,10], index: 1, kind: input, shape index: {}]   ;;  %s541_s2 = inlined_call_operand.vmem [shape: f32[14,14], index: 2, kind: input, shape index: {}]   ;;  %s542_s3 = inlined_call_operand.vmem [shape: f32[8,14], index: 3, kind: input, shape index: {}]   ;;  %s543_s4 = inlined_call_operand.vmem [shape: f32[40,1], index: 4, kind: input, shape index: {}]   ;;  %s544_s5 = inlined_call_operand.hbm [shape: f32[8,8], index: 5, kind: output, shape index: {}]  }
   0x1   :  { %v31_v0 = vld [vmem:[%s539_s0] sm:$0xff]  ;;  %v22_v3 = vld [vmem:[%s540_s1 + $0x8] sm:$0x3f]  ;;  %402 = vset.pattern.permute.xlu0 %v442_v4 }
   0x2   :  { %v21_v1 = vld [vmem:[%s540_s1] sm:$0xff]  ;;  %367 = vmatprep.subr.msk.mxu0 %vm42_vm0, %v31_v0 }
   0x3   :  { %369 = vmatprep.mubr.msk.f32.mxu0 %vm42_vm0, %v21_v1  ;;  %v26_v2 = vld [vmem:[%s543_s4] sm:$0xff]  ;;  %368 = vmatpush3.xpose.msk.msra.mxu0 %vm42_vm0, %v31_v0 }
   0x4   :  { %10 = vsyncpa [#allocation3], 0  ;;  %34 = vperm.xlu0 %402, %v26_v2   ;;  %403 = vset.pattern.permute.xlu1 %v442_v4  ;;  %v27_v5 = vld [vmem:[%s543_s4 + $0x8] sm:$0x3f]  ;;  %v30_v6 = vld [vmem:[%s543_s4 + $0x20] sm:$0xff]  ;;  %vm139_vm1 = vcmask 113664  }
   0x5   :  { %v23_v7 = vld [vmem:[%s541_s2] sm:$0xff]  ;;  %v28_v8 = vld [vmem:[%s543_s4 + $0x10] sm:$0xff]  ;;  %v29_v9 = vld [vmem:[%s543_s4 + $0x18] sm:$0x3f]  ;;  %vm146_vm2 = vcmask 1045504   ;;  %vm443_vm3 = vmmov 1  }
   0x6   :  { %370 = vmatmul.mubr.msk.f32.vlgmr.msra.gmra.mrb[0].mxu0 %vm42_vm0, %v22_v3  ;;  %376 = vmatprep.mubr.msk.f32.mxu1 %vm139_vm1, %v23_v7  ;;  %vm506_vm4 = vmpackc.low %vm146_vm2, %vm443_vm3  ;;  %v24_v20 = vld [vmem:[%s541_s2 + $0x8] sm:$0x3f]  ;;  %v444_v21 = vmov 0.0|0.0   ;;  %vm445_vm5 = vmmov 0   ;;  %v446_v22 = vmov 0.0   ;;  %v25_v32 = vld [vmem:[%s542_s3] sm:$0xff] }
   0x7   :  { %131 = vperm.xlu1 %403, %v28_v8   ;;  %392 = vmatprep.subr.bf16.mxu0 %v444_v21  ;;  %vm308_vm6 = vcmask 63488   ;;  %vm333_vm7 = vcmask 64519   ;;  %s447_s3 = smov [#allocation2]  }
   0x8   :  { %39 = vperm.xlu0 %402, %v27_v5   ;;  %383 = vmatprep.mubr.msk.f32.mxu0 %vm445_vm5, %v446_v22  ;;  %s341_s11 = sshll.u32 %s447_s3, 4  ;;  %s342_s11 = int_to_ptr.vmem [resolvable:$true] %s341_s11 }
   0x9   :  { %s418_s12 = scalar_lea.vmem %s342_s11, 128  ;;  %p423_p1 = scmp.lt.s32.totalorder %s342_s11, %s342_s11 }
   0xa   :  { %p419_p0 = scmp.ne.s32.totalorder %s342_s11, %s418_s12  ;;  %p424_p2 = scmp.lt.s32.totalorder %s418_s12, %s418_s12 }
   0xb   :  { %136 = vperm.xlu1 %403, %v29_v9  }
   0xc   :  { %229 = vperm.xlu0 %402, %v30_v6   ;;  %p425_p3 = por %p424_p2, %p423_p1 }
   0xe   :  { %p426_p4 = pnand %p425_p3, %p419_p0 }
  0x83   :  { %v35_v10 = vpop.permute.xlu0 %34 }
  0x86   :  { %v132_v23 = vpop.permute.xlu1 %131 }
  0x87   :  { %v40_v11 = vpop.permute.xlu0 %39 }
  0x8a   :  { %v137_v24 = vpop.permute.xlu1 %136 }
  0x8b   :  { %v230_v33 = vpop.permute.xlu0 %229 }
  0xd9   :  { %v371_v12 = vpop.f32.mrb[0].mxu0 }
  0xda   :  { %v124_v13 = vadd.f32 %v371_v12, %v40_v11  ;;  %v118_v14 = vpop.f32.mrb[1].mxu0 }
  0xdb   :  { %v119_v15 = vadd.f32 %v118_v14, %v35_v10 }
  0xdc   :  { %404 = vtanh.f32 %v124_v13 }
  0xdd   :  { %406 = vtanh.f32 %v119_v15 }
  0xe6   :  { %v405_v16 = vpop.eup %404 }
  0xe7   :  { %v407_v17 = vpop.eup %406 }
  0xe8   :  { %v386_v19 = vpack.c.bf16 %v405_v16, %v407_v17 }
  0xea   :  { %388 = vmatprep.subr.msk.bf16.mxu1 %vm506_vm4, %v386_v19 }
  0xeb   :  { %391 = vmatpush3.bf16.msk.msra.mxu1 %vm506_vm4, %v386_v19 }
  0xee   :  { %377 = vmatmul.mubr.msk.f32.vlgmr.msra.gmra.mrb[0].mxu1 %vm139_vm1, %v24_v20 }
 0x1c1   :  { %v378_v25 = vpop.f32.mrb[0].mxu1 }
 0x1c2   :  { %v222_v26 = vadd.f32 %v378_v25, %v137_v24  ;;  %v216_v27 = vpop.f32.mrb[1].mxu1 }
 0x1c3   :  { %v217_v28 = vadd.f32 %v216_v27, %v132_v23 }
 0x1c4   :  { %408 = vtanh.f32 %v222_v26 }
 0x1c5   :  { %410 = vtanh.f32 %v217_v28 }
 0x1ce   :  { %v409_v29 = vpop.eup %408 }
 0x1cf   :  { %v411_v30 = vpop.eup %410 }
 0x1d0   :  { %v393_v31 = vpack.c.bf16 %v409_v29, %v411_v30 }
 0x1d2   :  { %395 = vmatpush3.bf16.msk.msra.mxu0 %vm506_vm4, %v393_v31 }
 0x1d5   :  { %384 = vmatmul.mubr.msk.f32.vlgmr.msra.gmra.mrb[2].mxu0 %vm139_vm1, %v25_v32 }
 0x2a8   :  { %v304_v34 = vpop.f32.mrb[2].mxu0 }
 0x2a9   :  { %v305_v35 = vadd.f32 %v304_v34, %v230_v33  ;;  %v385_v36 = vpop.f32.mrb[3].mxu0 }
 0x2ab   :  { %v309_v37 = vsel %vm308_vm6, %v305_v35, -inf  ;;  %v328_v38 = vmul.f32 0.5, %v305_v35 }
 0x2ac   :  { %v310_v39 = vrot.slane %v309_v37, 4 }
 0x2ad   :  { %412 = vtanh.f32 %v328_v38 }
 0x2ae   :  { %v311_v40 = vmax.f32 %v309_v37, %v310_v39 }
 0x2b0   :  { %v312_v41 = vrot.slane %v311_v40, 2 }
 0x2b2   :  { %v313_v42 = vmax.f32 %v311_v40, %v312_v41 }
 0x2b4   :  { %v314_v43 = vrot.slane %v313_v42, 1 }
 0x2b6   :  { %v315_v44 = vmax.f32 %v313_v42, %v314_v43 }
 0x2b7   :  { %v413_v45 = vpop.eup %412 }
 0x2b8   :  { %v316_v46 = vsub.f32 %v305_v35, %v315_v44  ;;  %v330_v47 = vadd.f32 1.0, %v413_v45 }
 0x2ba   :  { %v317_v48 = vmul.f32 1.442695, %v316_v46  ;;  %v331_v49 = vmul.f32 0.5, %v330_v47 }
 0x2bc   :  { %414 = vpow2.f32 %v317_v48  ;;  %334 = vst.msk [vmem:[#allocation2] sm:$0x80] %vm333_vm7, %v331_v49 }
 0x2c6   :  { %v415_v50 = vpop.eup %414 }
 0x2c7   :  { %v319_v51 = vsel %vm308_vm6, %v415_v50, 0.0 }
 0x2c8   :  { %v320_v52 = vrot.slane %v319_v51, 4 }
 0x2ca   :  { %v321_v53 = vadd.f32 %v320_v52, %v319_v51 }
 0x2cc   :  { %v322_v54 = vrot.slane %v321_v53, 2 }
 0x2ce   :  { %v323_v55 = vadd.f32 %v322_v54, %v321_v53 }
 0x2d0   :  { %v324_v56 = vrot.slane %v323_v55, 1 }
 0x2d2   :  { %v325_v57 = vadd.f32 %v324_v56, %v323_v55 }
 0x2d4   :  { %416 = vrcp.f32 %v325_v57 }
 0x2de   :  { %v417_v58 = vpop.eup %416 }
 0x2df   :  { %v327_v59 = vmul.f32 %v417_v58, %v415_v50 }
 0x2e1   :  { %332 = vst.msk [vmem:[#allocation2] sm:$0x7f] %vm308_vm6, %v327_v59 }
 0x2e2   :  { %429 = shalt.err (!%p426_p4)
}
 0x2e3   :  { %s430_s15 = scalar_lea.hbm %s544_s5, 128 }
 0x2e4   :  { %p431_p5 = scmp.ne.s32.totalorder %s544_s5, %s430_s15  ;;  %p434_p6 = scmp.lt.u32.totalorder %s430_s15, %s544_s5 }
 0x2e6   :  { %p436_p7 = pnand %p434_p6, %p431_p5 }
 0x2e8   :  { %439 = shalt.err (!%p436_p7)
}
 0x2e9   :  { %344 = dma.vmem_to_hbm [thread:$0]  %s342_s11, 128, %s544_s5, [#allocation3]  }
 0x2ea   :  { %440 = dma.done.wait [#allocation3], 128  }
 0x2eb   :  { %441 = vsyncadd [#allocation3], 4294967168 }
 0x2ec   :  { %348 = vsyncpa [#allocation3], 1 }

</bundles_post_ra>
